<compile_context>
chip_gen: v5e
topology: v5e:2x2
jax: 0.10.0
libtpu: 0.0.40
codegen_flags: <defaults>
</compile_context>

<pallas_src>
import functools

import jax
import jax.numpy as jnp
from jax.experimental import pallas as pl
from jax.experimental.pallas import tpu as pltpu

GAMMA = 1.5
ALPHA = 0.25
LANES = 128
MAX_BLOCK_ROWS = 8192    # 8192 x 128 f32 = 4 MiB per input DMA buffer
CHUNK_ROWS = 1024        # in-kernel compute sub-tile (512 KiB f32)


def _round_up(x, m):
    return -(-x // m) * m


def _qfocal_kernel(pred_ref, true_ref, out_ref, *, gamma, alpha,
                   block_rows, chunk_rows, n_valid_last, needs_mask):
    n_chunks = block_rows // chunk_rows
    groups = chunk_rows // 8

    def chunk_slice(j):
        start = j * chunk_rows
        if not isinstance(start, int):
            start = pl.multiple_of(start, 8)   # sublane-aligned dynamic slice
        return pl.ds(start, chunk_rows)

    def chunk_loss(j):
        sl = chunk_slice(j)
        x = pred_ref[sl, :].astype(jnp.float32)
        t = true_ref[sl, :].astype(jnp.float32)

        # Shared transcendental: e = exp(-|x|) feeds both the stable BCE and
        # the sigmoid.
        e = jnp.exp(-jnp.abs(x))

        # BCEWithLogitsLoss, reduction='none', numerically stable form:
        #   max(x, 0) - x*t + log(1 + exp(-|x|))
        bce = jnp.maximum(x, 0.0) - x * t + jnp.log1p(e)

        # sigmoid(x): x>=0 -> 1/(1+e), x<0 -> e/(1+e).
        # Approx reciprocal on the EUP (vrcp) + one Newton step on the VPU:
        # cheaper than an exact divide, error ~eps^2 (effectively f32-exact).
        one_plus_e = 1.0 + e
        r = pl.reciprocal(one_plus_e, approx=True)
        inv = r * (2.0 - one_plus_e * r)
        pred_prob = jnp.where(x >= 0.0, inv, e * inv)

        # alpha_factor = t*alpha + (1-t)*(1-alpha), folded to one mul + add.
        alpha_factor = (1.0 - alpha) + t * (2.0 * alpha - 1.0)

        d = jnp.abs(t - pred_prob)
        if gamma == 1.5:
            # d**1.5 == d*sqrt(d); sqrt(0)=0 so no NaN when t == sigmoid(x).
            modulating_factor = d * jnp.sqrt(d)
        else:
            modulating_factor = d ** gamma

        return bce * alpha_factor * modulating_factor

    def reduce_chunk(l):
        # Reduce only across vreg groups (pure VPU adds) -> lane-dense (8,128).
        return jnp.sum(l.reshape(groups, 8, LANES), axis=0)

    def accumulate(body):
        zero = jnp.zeros((8, LANES), jnp.float32)
        if n_chunks == 1:
            return body(0, zero)
        return jax.lax.fori_loop(0, n_chunks, body, zero)

    def unmasked_body(j, acc):
        return acc + reduce_chunk(chunk_loss(j))

    if not needs_mask:
        out_ref[...] = accumulate(unmasked_body)
        return

    def masked_body(j, acc):
        loss = chunk_loss(j)
        row = jax.lax.broadcasted_iota(jnp.int32, (chunk_rows, LANES), 0)
        lane = jax.lax.broadcasted_iota(jnp.int32, (chunk_rows, LANES), 1)
        # Block-local linear index (<= block_rows*128, no int32 overflow risk).
        linear = (j * chunk_rows + row) * LANES + lane
        # Select (not multiply): out-of-bounds VMEM of a ragged last block is
        # arbitrary (possibly NaN/Inf); where() discards it exactly.
        loss = jnp.where(linear < n_valid_last, loss, 0.0)
        return acc + reduce_chunk(loss)

    is_last = pl.program_id(0) == pl.num_programs(0) - 1

    @pl.when(jnp.logical_not(is_last))
    def _():
        out_ref[...] = accumulate(unmasked_body)

    @pl.when(is_last)
    def _():
        out_ref[...] = accumulate(masked_body)


def qfocal_loss(pred, true, gamma=GAMMA, alpha=ALPHA, reduction="mean"):
    assert pred.shape == true.shape
    n_elems = pred.size
    assert n_elems > 0

    rows = _round_up(n_elems, LANES) // LANES     # ceil(n / 128) lane-rows
    arr_rows = max(rows, 8)                       # need at least one (8,128) tile

    # Block sizing: target ~half the rows so grid_size >= 2 (both v7x TCs get
    # work), cap at MAX_BLOCK_ROWS, keep a multiple of CHUNK_ROWS when larger
    # than one chunk so the in-kernel loop divides evenly.
    half = -(-arr_rows // 2)
    if half <= CHUNK_ROWS:
        block_rows = _round_up(half, 8)
        chunk_rows = block_rows
    else:
        block_rows = min(MAX_BLOCK_ROWS, _round_up(half, CHUNK_ROWS))
        chunk_rows = CHUNK_ROWS
    grid_size = -(-arr_rows // block_rows)

    covered = grid_size * block_rows * LANES
    needs_mask = covered != n_elems
    n_valid_last = n_elems - (grid_size - 1) * block_rows * LANES

    pred_flat = pred.reshape(-1)
    true_flat = true.reshape(-1)
    padded_n = arr_rows * LANES
    if padded_n != n_elems:
        # Pad only to a 128-lane multiple (skipped when already aligned);
        # ragged last blocks are handled by the in-kernel mask, not padding.
        pad = padded_n - n_elems
        pred_flat = jnp.pad(pred_flat, (0, pad))
        true_flat = jnp.pad(true_flat, (0, pad))
    pred2d = pred_flat.reshape(arr_rows, LANES)
    true2d = true_flat.reshape(arr_rows, LANES)

    kernel = functools.partial(
        _qfocal_kernel, gamma=gamma, alpha=alpha, block_rows=block_rows,
        chunk_rows=chunk_rows, n_valid_last=n_valid_last,
        needs_mask=needs_mask)

    partials = pl.pallas_call(
        kernel,
        out_shape=jax.ShapeDtypeStruct((grid_size, 8, LANES), jnp.float32),
        grid_spec=pltpu.PrefetchScalarGridSpec(
            num_scalar_prefetch=0,
            grid=(grid_size,),
            in_specs=[
                pl.BlockSpec((block_rows, LANES), lambda i: (i, 0)),
                pl.BlockSpec((block_rows, LANES), lambda i: (i, 0)),
            ],
            out_specs=pl.BlockSpec((None, 8, LANES), lambda i: (i, 0, 0)),
        ),
        compiler_params=pltpu.CompilerParams(
            dimension_semantics=("parallel",),        # megacore-shardable
            vmem_limit_bytes=48 * 1024 * 1024,        # v5e default (16 MiB) is too tight
        ),
    )(pred2d, true2d)

    total = jnp.sum(partials, dtype=jnp.float32)
    if reduction == "mean":
        return total / jnp.float32(n_elems)
    if reduction == "sum":
        return total
    # TODO(synk): reduction == 'none' needs an elementwise-output kernel
    # variant; raise instead of silently returning the mean.
    raise NotImplementedError("qfocal_loss: reduction='none' not implemented")


def _qfocal_ref(pred, true, gamma=GAMMA, alpha=ALPHA):
    x = pred.astype(jnp.float32)
    t = true.astype(jnp.float32)
    bce = jnp.maximum(x, 0.0) - x * t + jnp.log1p(jnp.exp(-jnp.abs(x)))
    p = jax.nn.sigmoid(x)
    loss = bce * (t * alpha + (1 - t) * (1 - alpha)) * jnp.abs(t - p) ** gamma
    return loss.mean()


if __name__ == "__main__":
    key = jax.random.PRNGKey(0)
    k1, k2, k3, k4, k5, k6 = jax.random.split(key, 6)

    # NCHW-shaped logits and targets, as the PyTorch module would receive.
    pred = jax.random.normal(k1, (2, 4, 16, 16), dtype=jnp.float32)
    true = (jax.random.uniform(k2, (2, 4, 16, 16)) > 0.5).astype(jnp.float32)
    out = jax.block_until_ready(qfocal_loss(pred, true))
    ref = _qfocal_ref(pred, true)
    assert jnp.allclose(out, ref, rtol=5e-4, atol=1e-5), (out, ref)

    # Non-128-aligned shape exercises the lane-pad + masked-last-block path.
    pred2 = jax.random.normal(k3, (2, 3, 13, 13), dtype=jnp.float32)
    true2 = (jax.random.uniform(k4, (2, 3, 13, 13)) > 0.5).astype(jnp.float32)
    out2 = jax.block_until_ready(qfocal_loss(pred2, true2))
    ref2 = _qfocal_ref(pred2, true2)
    assert jnp.allclose(out2, ref2, rtol=5e-4, atol=1e-5), (out2, ref2)

    # bf16 logits stream as bf16 (half HBM traffic) and upcast in-kernel.
    out3 = jax.block_until_ready(qfocal_loss(pred.astype(jnp.bfloat16), true))
    ref3 = _qfocal_ref(pred.astype(jnp.bfloat16), true)
    assert jnp.allclose(out3, ref3, rtol=5e-4, atol=1e-5), (out3, ref3)

    # Larger YOLO-like tensor exercises the multi-chunk fori_loop path and the
    # ragged last block (grid=2, 3 chunks/block, last block mostly OOB->masked).
    pred4 = jax.random.normal(k5, (1, 3, 32, 80, 80), dtype=jnp.float32)
    true4 = (jax.random.uniform(k6, (1, 3, 32, 80, 80)) > 0.5).astype(jnp.float32)
    out4 = jax.block_until_ready(qfocal_loss(pred4, true4))
    ref4 = _qfocal_ref(pred4, true4)
    assert jnp.allclose(out4, ref4, rtol=5e-4, atol=1e-5), (out4, ref4)

    print("KERNEL_OK")
</pallas_src>

<mosaic_0001>
module attributes {stable_mosaic.version = 11 : i64} {
  func.func @_qfocal_kernel(%arg0: i32, %arg1: memref<8x128xf32, #tpu.memory_space<vmem>>, %arg2: memref<8x128xf32, #tpu.memory_space<vmem>>, %arg3: memref<1x8x128xf32, #tpu.memory_space<vmem>>) attributes {dimension_semantics = [#tpu.dimension_semantics<parallel>], iteration_bounds = array<i64: 2>, scalar_prefetch = 0 : i64, scratch_operands = 0 : i64, tpu.core_type = #tpu.core_type<tc>, window_params = [{transform_indices = @transform_0, window_bounds = array<i64: 8, 128>}, {transform_indices = @transform_1, window_bounds = array<i64: 8, 128>}, {transform_indices = @transform_2, window_bounds = array<i64: 1, 8, 128>}]} {
    %cst = arith.constant 0.000000e+00 : f32
    %0 = vector.broadcast %cst : f32 to vector<8x128xf32>
    %c0 = arith.constant 0 : index
    %c0_0 = arith.constant 0 : index
    %1 = vector.load %arg1[%c0, %c0_0] : memref<8x128xf32, #tpu.memory_space<vmem>>, vector<8x128xf32>
    %c0_1 = arith.constant 0 : index
    %c0_2 = arith.constant 0 : index
    %2 = vector.load %arg2[%c0_1, %c0_2] : memref<8x128xf32, #tpu.memory_space<vmem>>, vector<8x128xf32>
    %3 = math.absf %1 : vector<8x128xf32>
    %cst_3 = arith.constant 0.000000e+00 : f32
    %4 = vector.broadcast %cst_3 : f32 to vector<8x128xf32>
    %5 = arith.subf %4, %3 : vector<8x128xf32>
    %6 = math.exp %5 : vector<8x128xf32>
    %cst_4 = arith.constant 0.000000e+00 : f32
    %7 = vector.broadcast %cst_4 : f32 to vector<8x128xf32>
    %8 = arith.maximumf %1, %7 : vector<8x128xf32>
    %9 = arith.mulf %1, %2 : vector<8x128xf32>
    %10 = arith.subf %8, %9 : vector<8x128xf32>
    %11 = math.log1p %6 : vector<8x128xf32>
    %12 = arith.addf %10, %11 : vector<8x128xf32>
    %cst_5 = arith.constant 1.000000e+00 : f32
    %13 = vector.broadcast %cst_5 : f32 to vector<8x128xf32>
    %14 = arith.addf %13, %6 : vector<8x128xf32>
    %15 = tpu.reciprocal %14 {approx = true} : vector<8x128xf32> -> vector<8x128xf32>
    %16 = arith.mulf %14, %15 : vector<8x128xf32>
    %cst_6 = arith.constant 2.000000e+00 : f32
    %17 = vector.broadcast %cst_6 : f32 to vector<8x128xf32>
    %18 = arith.subf %17, %16 : vector<8x128xf32>
    %19 = arith.mulf %15, %18 : vector<8x128xf32>
    %cst_7 = arith.constant 0.000000e+00 : f32
    %20 = vector.broadcast %cst_7 : f32 to vector<8x128xf32>
    %21 = arith.cmpf oge, %1, %20 : vector<8x128xf32>
    %22 = arith.mulf %6, %19 : vector<8x128xf32>
    %23 = arith.select %21, %19, %22 : vector<8x128xi1>, vector<8x128xf32>
    %cst_8 = arith.constant -5.000000e-01 : f32
    %24 = vector.broadcast %cst_8 : f32 to vector<8x128xf32>
    %25 = arith.mulf %2, %24 : vector<8x128xf32>
    %cst_9 = arith.constant 7.500000e-01 : f32
    %26 = vector.broadcast %cst_9 : f32 to vector<8x128xf32>
    %27 = arith.addf %26, %25 : vector<8x128xf32>
    %28 = arith.subf %2, %23 : vector<8x128xf32>
    %29 = math.absf %28 : vector<8x128xf32>
    %30 = math.sqrt %29 : vector<8x128xf32>
    %31 = arith.mulf %29, %30 : vector<8x128xf32>
    %32 = arith.mulf %12, %27 : vector<8x128xf32>
    %33 = arith.mulf %32, %31 : vector<8x128xf32>
    %34 = vector.shape_cast %33 : vector<8x128xf32> to vector<1x8x128xf32>
    %cst_10 = arith.constant dense<0.000000e+00> : vector<8x128xf32>
    %35 = vector.multi_reduction <add>, %34, %cst_10 [0] : vector<1x8x128xf32> to vector<8x128xf32>
    %36 = arith.addf %0, %35 : vector<8x128xf32>
    %c0_11 = arith.constant 0 : index
    %c0_12 = arith.constant 0 : index
    %c0_13 = arith.constant 0 : index
    %37 = vector.load %arg3[%c0_11, %c0_12, %c0_13] : memref<1x8x128xf32, #tpu.memory_space<vmem>>, vector<1x8x128xf32>
    %38 = vector.shape_cast %37 : vector<1x8x128xf32> to vector<8x128xf32>
    %39 = vector.shape_cast %36 : vector<8x128xf32> to vector<1x8x128xf32>
    tpu.vector_store %arg3[%c0_11, %c0_12, %c0_13], %39 {strides = array<i32>} : memref<1x8x128xf32, #tpu.memory_space<vmem>>, vector<1x8x128xf32>,
    return
  }
  func.func @transform_0(%arg0: i32) -> (i32, i32) {
    %c0_i32 = arith.constant 0 : i32
    %c0_i32_0 = arith.constant 0 : i32
    return %arg0, %c0_i32 : i32, i32
  }
  func.func @transform_1(%arg0: i32) -> (i32, i32) {
    %c0_i32 = arith.constant 0 : i32
    %c0_i32_0 = arith.constant 0 : i32
    return %arg0, %c0_i32 : i32, i32
  }
  func.func @transform_2(%arg0: i32) -> (i32, i32, i32) {
    %c0_i32 = arith.constant 0 : i32
    %c0_i32_0 = arith.constant 0 : i32
    %c0_i32_1 = arith.constant 0 : i32
    return %arg0, %c0_i32, %c0_i32_0 : i32, i32, i32
  }
}

</mosaic_0001>

<bundles_post_ra>
// kernel: tpu_custom_call.1
= control target key start
LH: loop header
LB: loop body
LE: loop exit
PB: predicated region body
PF: predicated region fallthrough
CT: control target
= control target key end

     0   :  { %7 = vsyncpa [#allocation3], 0  ;;  %s744_s0 = inlined_call_operand.hbm [shape: f32[16,128], index: 0, kind: input, shape index: {}]   ;;  %s745_s1 = inlined_call_operand.hbm [shape: f32[16,128], index: 1, kind: input, shape index: {}]   ;;  %s746_s2 = inlined_call_operand.hbm [shape: f32[2,8,128], index: 2, kind: output, shape index: {}]  }
   0x1   :  { %9 = vsyncpa [#allocation3 + $0x1], 0 }
   0x2   :  { %10 = vsyncpa [#allocation6], 0 }
   0x3   :  { %12 = vsyncpa [#allocation6 + $0x1], 0 }
   0x4   :  { %13 = vsyncpa [#allocation4], 0 }
   0x5   :  { %15 = vsyncpa [#allocation4 + $0x1], 0  ;;  %s579_s9 = smov 0   ;;  %s581_s10 = smov 0  }
   0x6   :  { %s583_s11 = smov 0   ;;  %s585_s12 = smov 0  }
   0x7 LB: > { %s600_s13 = sadd.s32 4294967295, %s562_s12   ;;  %s358_s14 = sadd.s32 4294967294, %s562_s12   ;;  %s562_s12 = sphi %s585_s12, %s757_s12   ;;  %s558_s11 = sphi %s583_s11, %s756_s11   ;;  %s554_s10 = sphi %s581_s10, %s755_s10   ;;  %s550_s9 = sphi %s579_s9, %s754_s9  }
   0x8   : > { %s604_s15 = sadd.s32 1, %s562_s12   ;;  %s28_s16 = sadd.s32 1, %s558_s11 }
   0x9   : > { %s25_s17 = ssub.s32 %s562_s12, %s604_s15  ;;  %p35_p0 = scmp.ne.s32.totalorder %s558_s11, %s554_s10 }
   0xa   : > { %p26_p1 = scmp.eq.s32.totalorder %s25_s17, 0  ;;  %p36_p2 = scmp.eq.s32.totalorder %s562_s12, 0 }
   0xb   : > { %p41_p3 = scmp.ne.s32.totalorder %s554_s10, %s550_s9  ;;  %p42_p4 = scmp.eq.s32.totalorder %s600_s13, 0 }
   0xc   : > { %s616_s18 = scalar_select %p26_p1, %s558_s11, %s28_s16  }
   0xd   : > { %p618_p5 = por %p36_p2, %p35_p0  ;;  %p622_p6 = por %p42_p4, %p41_p3 }
   0xe   : > { %p91_p7 = scmp.eq.s32.totalorder %s600_s13, 1  ;;  %p97_p8 = scmp.eq.s32.totalorder %s358_s14, 1 }
   0xf   : > { %p390_p10 = scmp.lt.s32.totalorder %s562_s12, 2  ;;  %s638_s23 = sand.u32 1, %s558_s11  }
  0x10   : > { %p629_p11 = por %p91_p7, %p35_p0  ;;  %p633_p12 = por %p97_p8, %p41_p3 }
  0x11   : > { %s362_s24 = sshll.u32 %s562_s12, 3  ;;  %s361_s25 = sshll.u32 %s638_s23, 3 }
  0x12   : > { %s125_s28 = scalar_lea.hbm %s744_s0, %s362_s24  ;;  %s121_s30 = scalar_lea.vmem [#allocation2], %s361_s25 }
  0x13   : > { %s127_s29 = sshll.u32 %s125_s28, 4  ;;  %s129_s3 = sshll.u32 %s121_s30, 4  ;;  %s128_s29 = int_to_ptr.hbm [resolvable:$true] %s127_s29  ;;  %s130_s3 = int_to_ptr.vmem [resolvable:$true] %s129_s3 }
  0x14   : > { %p647_p13 = pnand %p390_p10, %p618_p5  ;;  %p365_p0 = scmp.ge.s32.totalorder %s562_s12, 1 }
  0x15   : > { %p153_p1 = scmp.lt.s32.totalorder %s562_s12, 3  ;;  %s118_s5 = scalar_lea.sflag [#allocation3], %s638_s23 }
  0x16   : > { %s432_s6 = sshra.s32 %s128_s29, 4  ;;  %p436_p3 = pneg %p647_p13  ;;  %s433_s6 = int_to_ptr.hbm [resolvable:$true] %s432_s6 }
  0x17   : > { %s434_s7 = scalar_lea.hbm %s433_s6, 8  ;;  %s439_s16 = scalar_lea.hbm %s744_s0, 16 }
  0x18   : > { %p435_p2 = scmp.ne.s32.totalorder %s433_s6, %s434_s7  ;;  %p440_p5 = scmp.lt.s32.totalorder %s433_s6, %s744_s0 }
  0x19   : > { %p441_p8 = scmp.lt.s32.totalorder %s439_s16, %s434_s7 }
  0x1a   : > { %p437_p4 = pnand %p436_p3, %p435_p2 }
  0x1b   : > { %p442_p10 = por %p441_p8, %p440_p5 }
  0x1c   : > { %p438_p7 = pneg %p437_p4 }
  0x1e   : > { %p443_p9 = pnand %p442_p10, %p438_p7 }
  0x20   : > { %446 = shalt.err (!%p443_p9)
}
  0x21   : > { %382 = dma.hbm_to_vmem [thread:$0]  (!%p647_p13), %s128_s29, 128, %s130_s3, %s118_s5  }
  0x22   : > { %p671_p2 = pnand %p365_p0, %p153_p1  ;;  %s144_s30 = scalar_lea.hbm %s745_s1, %s362_s24 }
  0x23   : > { %s146_s6 = sshll.u32 %s144_s30, 4  ;;  %s140_s7 = scalar_lea.vmem [#allocation5], %s361_s25  ;;  %s147_s6 = int_to_ptr.hbm [resolvable:$true] %s146_s6 }
  0x24   : > { %s148_s8 = sshll.u32 %s140_s7, 4  ;;  %s137_s14 = scalar_lea.sflag [#allocation6], %s638_s23  ;;  %s149_s8 = int_to_ptr.vmem [resolvable:$true] %s148_s8 }
  0x25   : > { %s462_s16 = sshra.s32 %s147_s6, 4  ;;  %s469_s5 = scalar_lea.hbm %s745_s1, 16  ;;  %s463_s16 = int_to_ptr.hbm [resolvable:$true] %s462_s16 }
  0x26   : > { %s464_s17 = scalar_lea.hbm %s463_s16, 8  ;;  %p470_p4 = scmp.lt.s32.totalorder %s463_s16, %s745_s1 }
  0x27   : > { %p465_p9 = scmp.ne.s32.totalorder %s463_s16, %s464_s17  ;;  %p471_p7 = scmp.lt.s32.totalorder %s469_s5, %s464_s17 }
  0x29   : > { %p467_p0 = pnand %p465_p9, %p436_p3  ;;  %p472_p5 = por %p471_p7, %p470_p4 }
  0x2b   : > { %p468_p1 = pneg %p467_p0 }
  0x2d   : > { %p473_p8 = pnand %p472_p5, %p468_p1 }
  0x2f   : > { %476 = shalt.err (!%p473_p8)
}
  0x30   : > { %385 = dma.hbm_to_vmem [thread:$0]  (!%p647_p13), %s147_s6, 128, %s149_s8, %s137_s14  }
  0x31   : > { %157 = sbr.rel (%p671_p2) target bundleno = 121 (0x79), region = 28  ;;  %s693_s23 = sand.u32 (!%p671_p2), 1, %s554_s10  }
  0x32   : > { %s696_s25 = sshll.u32 (!%p671_p2), %s693_s23, 3  ;;  %s160_s27 = scalar_lea.sflag (!%p671_p2), [#allocation3], %s693_s23 }
  0x33   : > { %s163_s28 = scalar_lea.vmem (!%p671_p2), [#allocation2], %s696_s25 }
  0x36   : > { %537 = dma.done.wait (%p622_p6), %s160_s27, 128  }
  0x37   : > { %539 = vsyncadd (%p622_p6), %s160_s27, 4294967168  ;;  %s170_s4 = scalar_lea.sflag [#allocation6], %s693_s23  ;;  %s173_s26 = scalar_lea.vmem [#allocation5], %s696_s25 }
  0x38   : > { %541 = dma.done.wait (%p622_p6), %s170_s4, 128  }
  0x39   : > { %543 = vsyncadd (%p622_p6), %s170_s4, 4294967168  ;;  %v200_v0 = vld [vmem:[%s163_s28] sm:$0xff]  ;;  %v201_v10 = vld [vmem:[%s173_s26] sm:$0xff]  ;;  %s370_s20 = sshll.u32 %s600_s13, 3  ;;  %s199_s8 = scalar_lea.vmem [#allocation7], %s696_s25 }
  0x3a   : > { %v202_v1 = vand.u32 2147483647, %v200_v0  ;;  %vm224_vm0 = vcmp.ge.f32.partialorder %v200_v0, 0.0  ;;  %v206_v20 = vmax.f32 %v200_v0, 0.0  ;;  %v207_v21 = vmul.f32 %v201_v10, %v200_v0  ;;  %s260_s7 = scalar_lea.hbm %s746_s2, %s370_s20  ;;  %s262_s14 = sshll.u32 %s199_s8, 4  ;;  %s263_s14 = int_to_ptr.vmem [resolvable:$true] %s262_s14 }
  0x3b   : > { %v227_v27 = vmul.f32 -0.5, %v201_v10  ;;  %s264_s16 = sshll.u32 %s260_s7, 4  ;;  %s250_s13 = scalar_lea.sflag [#allocation4], %s693_s23  ;;  %s265_s16 = int_to_ptr.hbm [resolvable:$true] %s264_s16 }
  0x3c   : > { %v203_v2 = vsub.f32 0.0, %v202_v1  ;;  %v208_v26 = vsub.f32 %v206_v20, %v207_v21  ;;  %s506_s17 = sshra.s32 %s265_s16, 4  ;;  %s512_s19 = scalar_lea.hbm %s746_s2, 16  ;;  %s507_s17 = int_to_ptr.hbm [resolvable:$true] %s506_s17 }
  0x3d   : > { %v228_v32 = vadd.f32 0.75, %v227_v27  ;;  %s508_s29 = scalar_lea.hbm %s507_s17, 8  ;;  %p513_p10 = scmp.lt.s32.totalorder %s507_s17, %s746_s2 }
  0x3e   : > { %v204_v3 = vmul.f32 1.442695, %v203_v2  ;;  %p509_p6 = scmp.ne.s32.totalorder %s507_s17, %s508_s29  ;;  %p514_p2 = scmp.lt.s32.totalorder %s512_s19, %s508_s29 }
  0x40   : > { %424 = vpow2.f32 %v204_v3  ;;  %p510_p13 = pnand %p509_p6, %p629_p11  ;;  %p515_p9 = por %p514_p2, %p513_p10 }
  0x42   : > { %p511_p3 = pneg %p510_p13 }
  0x44   : > { %p516_p0 = pnand %p515_p9, %p511_p3 }
  0x46   : > { %v425_v4 = vpop.eup %424 }
  0x47   : > { %v209_v5 = vadd.f32 1.0, %v425_v4  ;;  %v212_v15 = vmul.f32 -0.5, %v425_v4  ;;  %v215_v18 = vand.u32 2147483647, %v425_v4 }
  0x49   : > { %426 = vrcp.f32 %v209_v5  ;;  %v213_v16 = vadd.f32 1.0, %v212_v15  ;;  %vm216_vm1 = vcmp.lt.f32.partialorder %v215_v18, 0.0004427343 }
  0x4a   : > { %428 = vlog2.f32 %v209_v5 }
  0x4b   : > { %v214_v24 = vmul.f32 %v425_v4, %v213_v16 }
  0x4f   : > { %v427_v6 = vpop.eup %426 }
  0x50   : > { %v221_v7 = vmul.f32 %v427_v6, %v209_v5  ;;  %v429_v17 = vpop.eup %428 }
  0x51   : > { %v211_v23 = vmul.f32 0.6931472, %v429_v17 }
  0x52   : > { %v222_v8 = vsub.f32 2.0, %v221_v7 }
  0x53   : > { %v217_v29 = vsel %vm216_vm1, %v214_v24, %v211_v23 }
  0x54   : > { %v223_v9 = vmul.f32 %v427_v6, %v222_v8  ;;  %v218_v31 = vadd.f32 %v217_v29, %v208_v26 }
  0x56   : > { %v225_v11 = vmul.f32 %v425_v4, %v223_v9  ;;  %v244_v37 = vmul.f32 %v228_v32, %v218_v31 }
  0x58   : > { %v226_v12 = vsel %vm224_vm0, %v223_v9, %v225_v11 }
  0x59   : > { %v229_v13 = vsub.f32 %v201_v10, %v226_v12 }
  0x5b   : > { %v230_v14 = vand.u32 2147483647, %v229_v13 }
  0x5d   : > { %430 = vrsqrt.f32 %v230_v14  ;;  %vm238_vm2 = vcmp.eq.f32.partialorder %v230_v14, inf  ;;  %v241_v34 = vand.u32 2147483648, %v230_v14  ;;  %vm240_vm3 = vcmp.eq.f32.partialorder %v230_v14, 0.0 }
  0x63   : > { %v431_v19 = vpop.eup %430 }
  0x64   : > { %v232_v22 = vmul.f32 %v431_v19, %v230_v14 }
  0x66   : > { %v233_v25 = vmul.f32 %v431_v19, %v232_v22 }
  0x68   : > { %v234_v28 = vmul.f32 0.5, %v233_v25 }
  0x6a   : > { %v235_v30 = vsub.f32 1.5, %v234_v28 }
  0x6c   : > { %v236_v33 = vmul.f32 %v431_v19, %v235_v30 }
  0x6e   : > { %v237_v35 = vmul.f32 %v236_v33, %v230_v14 }
  0x70   : > { %v239_v36 = vsel %vm238_vm2, %v230_v14, %v237_v35 }
  0x71   : > { %v242_v38 = vsel %vm240_vm3, %v241_v34, %v239_v36 }
  0x72   : > { %v243_v39 = vmul.f32 %v242_v38, %v230_v14 }
  0x74   : > { %v245_v40 = vmul.f32 %v244_v37, %v243_v39 }
  0x76   : > { %248 = vst [vmem:[%s199_s8] sm:$0xff] %v245_v40 }
  0x77   : > { %519 = shalt.err (!%p516_p0)
}
  0x78   : > { %377 = dma.vmem_to_hbm [thread:$0]  (%p629_p11), %s263_s14, 128, %s265_s16, %s250_s13  }
  0x79 PF: > { %s276_s23 = sand.u32 1, %s550_s9   ;;  %p753_p1 = scmp.ge.s32.totalorder %s562_s12, 2 }
  0x7a   : > { %s277_s27 = scalar_lea.sflag [#allocation4], %s276_s23 }
  0x7b   : > { %p387_p4 = pnand %p753_p1, %p633_p12 }
  0x7d   : > { %p388_p7 = pneg %p387_p4 }
  0x7f   : > { %545 = dma.done.wait (%p388_p7), %s277_s27, 128  }
  0x80   : > { %547 = vsyncadd (%p388_p7), %s277_s27, 4294967168  ;;  %p18_p5 = scmp.ge.s32.totalorder %s604_s15, 4   ;;  %s754_s9 = smov %s554_s10 }
  0x81   : > { %s755_s10 = smov %s558_s11  ;;  %s756_s11 = smov %s616_s18 }
  0x82   : > { %s757_s12 = smov %s604_s15  ;;  %20 = sbr.rel (!%p18_p5) target bundleno = 7 (0x7), region = 86 }
  0x87   :  { %283 = vsyncpa [#allocation3], 1 }
  0x88   :  { %285 = vsyncpa [#allocation3 + $0x1], 1 }
  0x89   :  { %286 = vsyncpa [#allocation6], 1 }
  0x8a   :  { %288 = vsyncpa [#allocation6 + $0x1], 1 }
  0x8b   :  { %289 = vsyncpa [#allocation4], 1 }
  0x8c   :  { %291 = vsyncpa [#allocation4 + $0x1], 1 }

</bundles_post_ra>
